<compile_context>
chip_gen: v7x
topology: tpu7x:2x2x1
jax: 0.10.0
libtpu: 0.0.40
codegen_flags: <defaults>
</compile_context>

<pallas_src>
import functools

import jax
import jax.numpy as jnp
from jax.experimental import pallas as pl
from jax.experimental.pallas import tpu as pltpu


def _round_up(x, m):
    return (x + m - 1) // m * m


# --------------------------------------------------------------------------
# Kernel 1: scatter-sum aggregation + (1+eps)*x + first Linear + partial BN stats
# --------------------------------------------------------------------------
def _gin_agg_linear1_kernel(n_real,                      # static python int
                            eps_ref,                     # VMEM (1, Dp)   f32
                            dst_ref,                     # VMEM (1, TILE_E) int32
                            msgs_ref,                    # VMEM (TILE_E, Dp) bf16
                            node_ref,                    # VMEM (TILE_N, Dp) f32
                            w1_ref,                      # VMEM (Dp, Hp) bf16 (resident)
                            b1_ref,                      # VMEM (1, Hp) f32 (resident)
                            h_ref,                       # out  (TILE_N, Hp) f32
                            stats_ref,                   # out  (1, 2, Hp) f32
                            acc_ref):                    # scratch (TILE_N, Dp) f32
    i = pl.program_id(0)
    e = pl.program_id(1)
    tile_n = acc_ref.shape[0]
    tile_e = dst_ref.shape[1]

    @pl.when(e == 0)
    def _():
        acc_ref[...] = jnp.zeros_like(acc_ref)

    # On-chip one-hot of edge destinations for this (row-tile, edge-tile):
    # exact in bf16, rides the MXU, no [N, E] array ever touches HBM.
    rows = jax.lax.broadcasted_iota(jnp.int32, (tile_n, tile_e), 0) + i * tile_n
    onehot = (dst_ref[...] == rows).astype(jnp.bfloat16)          # (TILE_N, TILE_E)
    acc_ref[...] += jnp.dot(onehot, msgs_ref[...],
                            preferred_element_type=jnp.float32)   # f32 accumulate

    @pl.when(e == pl.num_programs(1) - 1)
    def _():
        # rst = (1 + eps) * x + neigh     (f32)
        rst = (1.0 + eps_ref[...]) * node_ref[...] + acc_ref[...]
        # first Linear (bf16 operands, f32 accumulation) + bias
        h = jnp.dot(rst.astype(jnp.bfloat16), w1_ref[...],
                    preferred_element_type=jnp.float32) + b1_ref[...]
        h_ref[...] = h

        # Partial BatchNorm statistics for this row tile (padded rows masked out
        # so global mean/var stay exact over the real N rows).
        row_ids = jax.lax.broadcasted_iota(jnp.int32, h.shape, 0) + i * tile_n
        valid = (row_ids < n_real).astype(jnp.float32)
        hv = h * valid
        s = jnp.sum(hv, axis=0, keepdims=True)                    # (1, Hp)
        ss = jnp.sum(hv * h, axis=0, keepdims=True)               # (1, Hp)
        stats_ref[...] = jnp.concatenate([s, ss], axis=0)[None, :, :]


# --------------------------------------------------------------------------
# Kernel 2: BatchNorm (folded into scale/shift) -> ReLU -> second Linear
# --------------------------------------------------------------------------
def _gin_bn_relu_linear2_kernel(h_ref,                   # VMEM (TILE_N, Hp) f32
                                scale_ref,               # VMEM (1, Hp) f32 (resident)
                                shift_ref,               # VMEM (1, Hp) f32 (resident)
                                w2_ref,                  # VMEM (Hp, Dp) bf16 (resident)
                                b2_ref,                  # VMEM (1, Dp) f32 (resident)
                                out_ref):                # out  (TILE_N, Dp)
    h = h_ref[...] * scale_ref[...] + shift_ref[...]     # BN normalize + affine
    h = jnp.maximum(h, 0.0)                              # ReLU
    out = jnp.dot(h.astype(jnp.bfloat16), w2_ref[...],
                  preferred_element_type=jnp.float32) + b2_ref[...]
    out_ref[...] = out.astype(out_ref.dtype)


# --------------------------------------------------------------------------
# Wrapper
# --------------------------------------------------------------------------
def gin_conv(eps, node_feat, edge_feat, src, dst, params, *, tile_n=256, tile_e=512):
    """GINConv forward. Index glue (gather, padding, stats fold) in JAX,
    hot paths (aggregation + both Linears + BN apply) in Pallas."""
    N, D = node_feat.shape
    E = edge_feat.shape[0]
    H = 2 * D
    w1, b1, gamma, beta, w2, b2 = params

    f32, bf16 = jnp.float32, jnp.bfloat16

    # Lane-dense padded layout: feature dims to multiples of 128.
    Dp = _round_up(D, 128)
    Hp = _round_up(H, 128)

    tile_n = _round_up(max(8, min(tile_n, _round_up(N, 8))), 8)
    n_pad = _round_up(N, tile_n)
    tile_e = _round_up(max(128, min(tile_e, _round_up(E, 128))), 128)
    e_pad = _round_up(E, tile_e)
    n_tiles_n = n_pad // tile_n
    n_tiles_e = e_pad // tile_e

    # Glue: per-edge messages (gather + add, fused by XLA), zero-pad, bf16 stream.
    msgs = node_feat[src] + edge_feat                                       # (E, D) f32
    msgs_p = jnp.zeros((e_pad, Dp), bf16).at[:E, :D].set(msgs.astype(bf16))
    node_p = jnp.zeros((n_pad, Dp), f32).at[:N, :D].set(node_feat.astype(f32))
    dst_p = jnp.full((1, e_pad), -1, jnp.int32).at[0, :E].set(dst.astype(jnp.int32))

    w1_p = jnp.zeros((Dp, Hp), bf16).at[:D, :H].set(w1.astype(bf16))
    b1_p = jnp.zeros((1, Hp), f32).at[0, :H].set(b1.astype(f32))
    w2_p = jnp.zeros((Hp, Dp), bf16).at[:H, :D].set(w2.astype(bf16))
    b2_p = jnp.zeros((1, Dp), f32).at[0, :D].set(b2.astype(f32))
    eps_p = jnp.broadcast_to(eps.reshape(1, 1).astype(f32), (1, Dp))

    # ---- kernel 1: aggregation + Linear1 + partial BN stats ----------------
    kernel1 = functools.partial(_gin_agg_linear1_kernel, N)
    h_pad, stats_part = pl.pallas_call(
        kernel1,
        out_shape=(jax.ShapeDtypeStruct((n_pad, Hp), f32),
                   jax.ShapeDtypeStruct((n_tiles_n, 2, Hp), f32)),
        grid_spec=pltpu.PrefetchScalarGridSpec(
            num_scalar_prefetch=0,
            grid=(n_tiles_n, n_tiles_e),
            in_specs=[
                pl.BlockSpec((1, Dp), lambda i, e: (0, 0)),          # eps (resident)
                pl.BlockSpec((1, tile_e), lambda i, e: (0, e)),      # dst indices
                pl.BlockSpec((tile_e, Dp), lambda i, e: (e, 0)),     # msgs (bf16)
                pl.BlockSpec((tile_n, Dp), lambda i, e: (i, 0)),     # node feats
                pl.BlockSpec((Dp, Hp), lambda i, e: (0, 0)),         # W1 (resident)
                pl.BlockSpec((1, Hp), lambda i, e: (0, 0)),          # b1 (resident)
            ],
            out_specs=[
                pl.BlockSpec((tile_n, Hp), lambda i, e: (i, 0)),     # h
                pl.BlockSpec((1, 2, Hp), lambda i, e: (i, 0, 0)),    # partial stats
            ],
            scratch_shapes=[pltpu.VMEM((tile_n, Dp), f32)],          # neigh accumulator
        ),
        compiler_params=pltpu.CompilerParams(
            dimension_semantics=("parallel", "arbitrary")),
    )(eps_p, dst_p, msgs_p, node_p, w1_p, b1_p)

    # Tiny glue: global (exact) batch statistics, BN folded into scale/shift.
    stats = jnp.sum(stats_part, axis=0)                              # (2, Hp)
    mean = stats[0] / N
    var = jnp.maximum(stats[1] / N - mean * mean, 0.0)               # biased (training mode)
    gamma_p = jnp.ones((Hp,), f32).at[:H].set(gamma.astype(f32))
    beta_p = jnp.zeros((Hp,), f32).at[:H].set(beta.astype(f32))
    scale = (gamma_p * jax.lax.rsqrt(var + 1e-5)).reshape(1, Hp)
    shift = (beta_p - mean * scale[0]).reshape(1, Hp)

    # ---- kernel 2: BN -> ReLU -> Linear2 -----------------------------------
    out_pad = pl.pallas_call(
        _gin_bn_relu_linear2_kernel,
        out_shape=jax.ShapeDtypeStruct((n_pad, Dp), node_feat.dtype),
        grid_spec=pltpu.PrefetchScalarGridSpec(
            num_scalar_prefetch=0,
            grid=(n_tiles_n,),
            in_specs=[
                pl.BlockSpec((tile_n, Hp), lambda i: (i, 0)),        # h
                pl.BlockSpec((1, Hp), lambda i: (0, 0)),             # scale (resident)
                pl.BlockSpec((1, Hp), lambda i: (0, 0)),             # shift (resident)
                pl.BlockSpec((Hp, Dp), lambda i: (0, 0)),            # W2 (resident)
                pl.BlockSpec((1, Dp), lambda i: (0, 0)),             # b2 (resident)
            ],
            out_specs=pl.BlockSpec((tile_n, Dp), lambda i: (i, 0)),
        ),
        compiler_params=pltpu.CompilerParams(dimension_semantics=("parallel",)),
    )(h_pad, scale, shift, w2_p, b2_p)

    return out_pad[:N, :D]


def gin_conv_reference(eps, node_feat, edge_feat, src, dst, params):
    """Plain-JAX f32 reference of the GINConv forward."""
    w1, b1, gamma, beta, w2, b2 = params
    msgs = node_feat[src] + edge_feat
    neigh = jnp.zeros_like(node_feat).at[dst].add(msgs)
    rst = (1.0 + eps[0]) * node_feat + neigh
    h = rst @ w1 + b1
    mean = h.mean(axis=0)
    var = ((h - mean) ** 2).mean(axis=0)
    h = (h - mean) * jax.lax.rsqrt(var + 1e-5) * gamma + beta
    h = jnp.maximum(h, 0.0)
    return h @ w2 + b2


def init_params(key, emb_dim):
    """Deterministic parameter init matching GINConv.__init__ shapes."""
    k1, k2, k3, k4 = jax.random.split(key, 4)
    D, H = emb_dim, 2 * emb_dim
    w1 = jax.random.normal(k1, (D, H), jnp.float32) * 0.1    # Linear(D, 2D), [in, out]
    b1 = jax.random.normal(k2, (H,), jnp.float32) * 0.1
    gamma = jnp.ones((H,), jnp.float32)                       # BatchNorm1d weight
    beta = jnp.zeros((H,), jnp.float32)                       # BatchNorm1d bias
    w2 = jax.random.normal(k3, (H, D), jnp.float32) * 0.1     # Linear(2D, D), [in, out]
    b2 = jax.random.normal(k4, (D,), jnp.float32) * 0.1
    eps = jnp.zeros((1,), jnp.float32)                        # nn.Parameter(torch.Tensor([0]))
    return eps, (w1, b1, gamma, beta, w2, b2)


if __name__ == "__main__":
    key = jax.random.PRNGKey(0)
    k_n, k_e, k_src, k_dst, k_p = jax.random.split(key, 5)

    emb_dim = 32      # D  (padded to 128 lanes inside the wrapper)
    num_nodes = 48    # N  -> 3 row tiles of 16
    num_edges = 256   # E  -> 2 edge tiles of 128

    node_feat = jax.random.normal(k_n, (num_nodes, emb_dim), jnp.float32)
    edge_feat = jax.random.normal(k_e, (num_edges, emb_dim), jnp.float32)
    src = jax.random.randint(k_src, (num_edges,), 0, num_nodes, jnp.int32)
    dst = jax.random.randint(k_dst, (num_edges,), 0, num_nodes, jnp.int32)

    eps, params = init_params(k_p, emb_dim)

    out = gin_conv(eps, node_feat, edge_feat, src, dst, params,
                   tile_n=16, tile_e=128)
    out = jax.block_until_ready(out)

    ref = gin_conv_reference(eps, node_feat, edge_feat, src, dst, params)
    ref = jax.block_until_ready(ref)

    assert out.shape == (num_nodes, emb_dim)
    assert jnp.all(jnp.isfinite(out))
    # bf16 MXU operands (f32 accumulation) => loose tolerance vs f32 reference.
    assert float(jnp.max(jnp.abs(out - ref))) < 1e-1
    print("KERNEL_OK")
</pallas_src>

<mosaic_0001>
module attributes {stable_mosaic.version = 11 : i64} {
  func.func @_gin_agg_linear1_kernel(%arg0: i32, %arg1: i32, %arg2: memref<1x128xf32, #tpu.memory_space<vmem>>, %arg3: memref<1x128xi32, #tpu.memory_space<vmem>>, %arg4: memref<128x128xbf16, #tpu.memory_space<vmem>>, %arg5: memref<16x128xf32, #tpu.memory_space<vmem>>, %arg6: memref<128x128xbf16, #tpu.memory_space<vmem>>, %arg7: memref<1x128xf32, #tpu.memory_space<vmem>>, %arg8: memref<16x128xf32, #tpu.memory_space<vmem>>, %arg9: memref<1x2x128xf32, #tpu.memory_space<vmem>>, %arg10: memref<16x128xf32, #tpu.memory_space<vmem>>) attributes {dimension_semantics = [#tpu.dimension_semantics<parallel>, #tpu.dimension_semantics<arbitrary>], iteration_bounds = array<i64: 3, 2>, scalar_prefetch = 0 : i64, scratch_operands = 1 : i64, tpu.core_type = #tpu.core_type<tc>, window_params = [{pipeline_mode = #tpu.pipeline_mode<synchronous>, transform_indices = @transform_0, window_bounds = array<i64: 1, 128>}, {transform_indices = @transform_1, window_bounds = array<i64: 1, 128>}, {transform_indices = @transform_2, window_bounds = array<i64: 128, 128>}, {transform_indices = @transform_3, window_bounds = array<i64: 16, 128>}, {pipeline_mode = #tpu.pipeline_mode<synchronous>, transform_indices = @transform_4, window_bounds = array<i64: 128, 128>}, {pipeline_mode = #tpu.pipeline_mode<synchronous>, transform_indices = @transform_5, window_bounds = array<i64: 1, 128>}, {transform_indices = @transform_6, window_bounds = array<i64: 16, 128>}, {transform_indices = @transform_7, window_bounds = array<i64: 1, 2, 128>}]} {
    %c0_i32 = arith.constant 0 : i32
    %0 = arith.cmpi eq, %arg1, %c0_i32 : i32
    %1 = arith.extui %0 : i1 to i32
    %c0_i32_0 = arith.constant 0 : i32
    %2 = arith.cmpi ne, %1, %c0_i32_0 : i32
    scf.if %2 {
      %cst_9 = arith.constant 0.000000e+00 : f32
      %21 = vector.broadcast %cst_9 : f32 to vector<16x128xf32>
      %c0_10 = arith.constant 0 : index
      %c0_11 = arith.constant 0 : index
      %22 = vector.load %arg10[%c0_10, %c0_11] : memref<16x128xf32, #tpu.memory_space<vmem>>, vector<16x128xf32>
      tpu.vector_store %arg10[%c0_10, %c0_11], %21 {strides = array<i32>} : memref<16x128xf32, #tpu.memory_space<vmem>>, vector<16x128xf32>,
    } else {
    }
    %3 = tpu.iota {dimensions = array<i32: 0>} : vector<16x128xi32>
    %c16_i32 = arith.constant 16 : i32
    %4 = arith.muli %arg0, %c16_i32 : i32
    %5 = vector.broadcast %4 : i32 to vector<16x128xi32>
    %6 = arith.addi %3, %5 : vector<16x128xi32>
    %c0 = arith.constant 0 : index
    %c0_1 = arith.constant 0 : index
    %7 = vector.load %arg3[%c0, %c0_1] : memref<1x128xi32, #tpu.memory_space<vmem>>, vector<1x128xi32>
    %8 = vector.broadcast %7 : vector<1x128xi32> to vector<16x128xi32>
    %9 = arith.cmpi eq, %8, %6 : vector<16x128xi32>
    %10 = arith.extui %9 : vector<16x128xi1> to vector<16x128xi32>
    %11 = arith.sitofp %10 : vector<16x128xi32> to vector<16x128xf32>
    %12 = arith.truncf %11 : vector<16x128xf32> to vector<16x128xbf16>
    %c0_2 = arith.constant 0 : index
    %c0_3 = arith.constant 0 : index
    %13 = vector.load %arg10[%c0_2, %c0_3] : memref<16x128xf32, #tpu.memory_space<vmem>>, vector<16x128xf32>
    %c0_4 = arith.constant 0 : index
    %c0_5 = arith.constant 0 : index
    %14 = vector.load %arg4[%c0_4, %c0_5] : memref<128x128xbf16, #tpu.memory_space<vmem>>, vector<128x128xbf16>
    %cst = arith.constant dense<0.000000e+00> : vector<16x128xf32>
    %15 = tpu.matmul %12, %14, %cst {dimension_numbers = #tpu.dot_dimension_numbers<[1], [0], [0], [1], [0, 0, 1, 1], [], []>} : vector<16x128xbf16>, vector<128x128xbf16>, vector<16x128xf32> -> vector<16x128xf32>
    %16 = arith.addf %13, %15 : vector<16x128xf32>
    %c0_6 = arith.constant 0 : index
    %c0_7 = arith.constant 0 : index
    %17 = vector.load %arg10[%c0_6, %c0_7] : memref<16x128xf32, #tpu.memory_space<vmem>>, vector<16x128xf32>
    tpu.vector_store %arg10[%c0_6, %c0_7], %16 {strides = array<i32>} : memref<16x128xf32, #tpu.memory_space<vmem>>, vector<16x128xf32>,
    %c1_i32 = arith.constant 1 : i32
    %18 = arith.cmpi eq, %arg1, %c1_i32 : i32
    %19 = arith.extui %18 : i1 to i32
    %c0_i32_8 = arith.constant 0 : i32
    %20 = arith.cmpi ne, %19, %c0_i32_8 : i32
    scf.if %20 {
      %c0_9 = arith.constant 0 : index
      %c0_10 = arith.constant 0 : index
      %21 = vector.load %arg2[%c0_9, %c0_10] : memref<1x128xf32, #tpu.memory_space<vmem>>, vector<1x128xf32>
      %cst_11 = arith.constant 1.000000e+00 : f32
      %22 = vector.broadcast %cst_11 : f32 to vector<1x128xf32>
      %23 = arith.addf %22, %21 : vector<1x128xf32>
      %c0_12 = arith.constant 0 : index
      %c0_13 = arith.constant 0 : index
      %24 = vector.load %arg5[%c0_12, %c0_13] : memref<16x128xf32, #tpu.memory_space<vmem>>, vector<16x128xf32>
      %25 = vector.broadcast %23 : vector<1x128xf32> to vector<16x128xf32>
      %26 = arith.mulf %25, %24 : vector<16x128xf32>
      %c0_14 = arith.constant 0 : index
      %c0_15 = arith.constant 0 : index
      %27 = vector.load %arg10[%c0_14, %c0_15] : memref<16x128xf32, #tpu.memory_space<vmem>>, vector<16x128xf32>
      %28 = arith.addf %26, %27 : vector<16x128xf32>
      %29 = arith.truncf %28 : vector<16x128xf32> to vector<16x128xbf16>
      %c0_16 = arith.constant 0 : index
      %c0_17 = arith.constant 0 : index
      %30 = vector.load %arg6[%c0_16, %c0_17] : memref<128x128xbf16, #tpu.memory_space<vmem>>, vector<128x128xbf16>
      %cst_18 = arith.constant dense<0.000000e+00> : vector<16x128xf32>
      %31 = tpu.matmul %29, %30, %cst_18 {dimension_numbers = #tpu.dot_dimension_numbers<[1], [0], [0], [1], [0, 0, 1, 1], [], []>} : vector<16x128xbf16>, vector<128x128xbf16>, vector<16x128xf32> -> vector<16x128xf32>
      %c0_19 = arith.constant 0 : index
      %c0_20 = arith.constant 0 : index
      %32 = vector.load %arg7[%c0_19, %c0_20] : memref<1x128xf32, #tpu.memory_space<vmem>>, vector<1x128xf32>
      %33 = vector.broadcast %32 : vector<1x128xf32> to vector<16x128xf32>
      %34 = arith.addf %31, %33 : vector<16x128xf32>
      %c0_21 = arith.constant 0 : index
      %c0_22 = arith.constant 0 : index
      %35 = vector.load %arg8[%c0_21, %c0_22] : memref<16x128xf32, #tpu.memory_space<vmem>>, vector<16x128xf32>
      tpu.vector_store %arg8[%c0_21, %c0_22], %34 {strides = array<i32>} : memref<16x128xf32, #tpu.memory_space<vmem>>, vector<16x128xf32>,
      %36 = tpu.iota {dimensions = array<i32: 0>} : vector<16x128xi32>
      %c16_i32_23 = arith.constant 16 : i32
      %37 = arith.muli %arg0, %c16_i32_23 : i32
      %38 = vector.broadcast %37 : i32 to vector<16x128xi32>
      %39 = arith.addi %36, %38 : vector<16x128xi32>
      %c48_i32 = arith.constant 48 : i32
      %40 = vector.broadcast %c48_i32 : i32 to vector<16x128xi32>
      %41 = arith.cmpi slt, %39, %40 : vector<16x128xi32>
      %42 = arith.extui %41 : vector<16x128xi1> to vector<16x128xi32>
      %43 = arith.sitofp %42 : vector<16x128xi32> to vector<16x128xf32>
      %44 = arith.mulf %34, %43 : vector<16x128xf32>
      %cst_24 = arith.constant dense<0.000000e+00> : vector<128xf32>
      %45 = vector.multi_reduction <add>, %44, %cst_24 [0] : vector<16x128xf32> to vector<128xf32>
      %46 = vector.shape_cast %45 : vector<128xf32> to vector<1x128xf32>
      %47 = arith.mulf %44, %34 : vector<16x128xf32>
      %cst_25 = arith.constant dense<0.000000e+00> : vector<128xf32>
      %48 = vector.multi_reduction <add>, %47, %cst_25 [0] : vector<16x128xf32> to vector<128xf32>
      %49 = vector.shape_cast %48 : vector<128xf32> to vector<1x128xf32>
      %50 = tpu.concatenate %46, %49 in 0 : vector<1x128xf32>, vector<1x128xf32> -> vector<2x128xf32>
      %51 = vector.shape_cast %50 : vector<2x128xf32> to vector<1x2x128xf32>
      %c0_26 = arith.constant 0 : index
      %c0_27 = arith.constant 0 : index
      %c0_28 = arith.constant 0 : index
      %52 = vector.load %arg9[%c0_26, %c0_27, %c0_28] : memref<1x2x128xf32, #tpu.memory_space<vmem>>, vector<1x2x128xf32>
      tpu.vector_store %arg9[%c0_26, %c0_27, %c0_28], %51 {strides = array<i32>} : memref<1x2x128xf32, #tpu.memory_space<vmem>>, vector<1x2x128xf32>,
    } else {
    }
    return
  }
  func.func @transform_0(%arg0: i32, %arg1: i32) -> (i32, i32) {
    %c0_i32 = arith.constant 0 : i32
    %c0_i32_0 = arith.constant 0 : i32
    %c0_i32_1 = arith.constant 0 : i32
    return %c0_i32, %c0_i32_0 : i32, i32
  }
  func.func @transform_1(%arg0: i32, %arg1: i32) -> (i32, i32) {
    %c0_i32 = arith.constant 0 : i32
    %c0_i32_0 = arith.constant 0 : i32
    return %c0_i32, %arg1 : i32, i32
  }
  func.func @transform_2(%arg0: i32, %arg1: i32) -> (i32, i32) {
    %c0_i32 = arith.constant 0 : i32
    %c0_i32_0 = arith.constant 0 : i32
    return %arg1, %c0_i32 : i32, i32
  }
  func.func @transform_3(%arg0: i32, %arg1: i32) -> (i32, i32) {
    %c0_i32 = arith.constant 0 : i32
    %c0_i32_0 = arith.constant 0 : i32
    return %arg0, %c0_i32 : i32, i32
  }
  func.func @transform_4(%arg0: i32, %arg1: i32) -> (i32, i32) {
    %c0_i32 = arith.constant 0 : i32
    %c0_i32_0 = arith.constant 0 : i32
    %c0_i32_1 = arith.constant 0 : i32
    return %c0_i32, %c0_i32_0 : i32, i32
  }
  func.func @transform_5(%arg0: i32, %arg1: i32) -> (i32, i32) {
    %c0_i32 = arith.constant 0 : i32
    %c0_i32_0 = arith.constant 0 : i32
    %c0_i32_1 = arith.constant 0 : i32
    return %c0_i32, %c0_i32_0 : i32, i32
  }
  func.func @transform_6(%arg0: i32, %arg1: i32) -> (i32, i32) {
    %c0_i32 = arith.constant 0 : i32
    %c0_i32_0 = arith.constant 0 : i32
    return %arg0, %c0_i32 : i32, i32
  }
  func.func @transform_7(%arg0: i32, %arg1: i32) -> (i32, i32, i32) {
    %c0_i32 = arith.constant 0 : i32
    %c0_i32_0 = arith.constant 0 : i32
    %c0_i32_1 = arith.constant 0 : i32
    return %arg0, %c0_i32, %c0_i32_0 : i32, i32, i32
  }
}

</mosaic_0001>

<bundles_post_ra>
// kernel: tpu_custom_call.1
= control target key start
LH: loop header
LB: loop body
LE: loop exit
PB: predicated region body
PF: predicated region fallthrough
CT: control target
= control target key end

     0   :  { %s1975_s0 = inlined_call_operand.hbm [shape: f32[1,128], index: 0, kind: input, shape index: {}]   ;;  %s1976_s1 = inlined_call_operand.vmem [shape: s32[1,256], index: 1, kind: input, shape index: {}]   ;;  %s1977_s2 = inlined_call_operand.hbm [shape: bf16[256,128], index: 2, kind: input, shape index: {}]   ;;  %s1978_s3 = inlined_call_operand.hbm [shape: f32[48,128], index: 3, kind: input, shape index: {}]   ;;  %s1979_s4 = inlined_call_operand.hbm [shape: bf16[128,128], index: 4, kind: input, shape index: {}]   ;;  %s1980_s5 = inlined_call_operand.vmem [shape: f32[1,128], index: 5, kind: input, shape index: {}]   ;;  %s1981_s6 = inlined_call_operand.hbm [shape: f32[48,128], index: 6, kind: output, shape index: {0}]   ;;  %s1982_s7 = inlined_call_operand.hbm [shape: f32[3,2,128], index: 7, kind: output, shape index: {1}]  }
   0x1   :  { %2001 = sst [smem:[#allocation26_spill]] %s1975_s0 }
   0x2   :  { %2002 = sst [smem:[#allocation27_spill]] %s1977_s2 }
   0x3   :  { %2003 = sst [smem:[#allocation28_spill]] %s1980_s5 }
   0x4   :  { %2004 = sst [smem:[#allocation29_spill]] %s1981_s6 }
   0x5   :  { %2005 = sst [smem:[#allocation30_spill]] %s1982_s7 }
   0x6   :  { %13 = vsyncpa [#allocation4], 0 }
   0x7   :  { %14 = vsyncpa [#allocation7], 0 }
   0x8   :  { %16 = vsyncpa [#allocation7 + $0x1], 0 }
   0x9   :  { %17 = vsyncpa [#allocation10], 0 }
   0xa   :  { %18 = vsyncpa [#allocation5], 0 }
   0xb   :  { %20 = vsyncpa [#allocation5 + $0x1], 0 }
   0xc   :  { %21 = vsyncpa [#allocation13], 0 }
   0xd   :  { %23 = vsyncpa [#allocation13 + $0x1], 0  ;;  %s1517_s24 = smov 0   ;;  %s1519_s25 = smov 0  }
   0xe   :  { %s1521_s26 = smov 0   ;;  %s1523_s27 = smov 0  }
   0xf   :  { %s1525_s28 = smov 0   ;;  %s1527_s29 = smov 0  }
  0x10   :  { %s1529_s30 = smov 0   ;;  %s1531_s8 = smov 0  }
  0x11   :  { %s1533_s9 = smov 0   ;;  %s1535_s10 = smov 0  }
  0x12   :  { %s1537_s11 = smov 0  }
  0x13 LB: > { %2006 = sst [smem:[#allocation20_spill]] %s1417_s24  ;;  %s38_s12 = sadd.s32 1, %s1449_s9  ;;  %s1457_s11 = sphi %s1537_s11, %s29_s11   ;;  %s1453_s10 = sphi %s1535_s10, %s2058_s10   ;;  %s1449_s9 = sphi %s1533_s9, %s2051_s9   ;;  %s1445_s8 = sphi %s1531_s8, %s2057_s8   ;;  %s1441_s30 = sphi %s1529_s30, %s2050_s30   ;;  %s1437_s29 = sphi %s1527_s29, %s2049_s29   ;;  %s1433_s28 = sphi %s1525_s28, %s2056_s28   ;;  %s1429_s27 = sphi %s1523_s27, %s2055_s27   ;;  %s1425_s26 = sphi %s1521_s26, %s2054_s26   ;;  %s1421_s25 = sphi %s1519_s25, %s2053_s25   ;;  %s1417_s24 = sphi %s1517_s24, %s2052_s24  }
  0x14   : > { %2007 = sst [smem:[#allocation21_spill]] %s1437_s29  ;;  %s95_s13 = sadd.s32 1, %s1437_s29 }
  0x15   : > { %2008 = sst [smem:[#allocation22_spill]] %s1449_s9  ;;  %p1574_p0 = scmp.ge.s32.totalorder %s38_s12, 2 }
  0x16   : > { %p102_p1 = scmp.ne.s32.totalorder %s1437_s29, %s1433_s28  ;;  %p1986_p2 = scmp.eq.s32.totalorder %s1457_s11, 0 }
  0x17   : > { %s2009_s14 = scalar_select %p1574_p0, 1, 0 }
  0x18   : > { %s2060_s12 = smov (%p1574_p0, %s38_s12), 0  ;;  %p1587_p3 = por %p1986_p2, %p102_p1 }
  0x19   : > { %2010 = sst [smem:[#allocation23_spill]] %s2060_s12  ;;  %s92_s16 = ssub.s32 %s1449_s9, %s2060_s12 }
  0x1a   : > { %p93_p4 = scmp.eq.s32.totalorder %s92_s16, 0  ;;  %p1985_p5 = scmp.lt.s32.totalorder %s1457_s11, 6 }
  0x1b   : > { %s285_s17 = sand.u32 1, %s1457_s11   ;;  %s287_s18 = sand.u32 1, %s1437_s29  }
  0x1c   : > { %s1597_s19 = scalar_select %p93_p4, %s1437_s29, %s95_s13  }
  0x1d   : > { %s906_s20 = sshll.u32 %s287_s18, 6  ;;  %s953_s21 = sshll.u32 %s1449_s9, 10 }
  0x1e   : > { %2012 = sst [smem:[#allocation24_spill]] %s1597_s19  ;;  %s2013_s2 = sld [smem:[#allocation27_spill]] }
  0x1f   : > { %s289_s6 = scalar_lea.vmem [#allocation6], %s906_s20  ;;  %p1611_p6 = pnand %p1985_p5, %p1587_p3 }
  0x20   : > { %s296_s5 = sshll.u32 %s289_s6, 4  ;;  %s1615_s16 = scalar_lea.sflag [#allocation7], %s285_s17  ;;  %s1605_s5 = int_to_ptr.vmem [resolvable:$true] %s296_s5 }
  0x21   : > { %p1177_p8 = pneg %p1611_p6 }
  0x24   : > { %s1603_s7 = scalar_lea.hbm %s2013_s2, %s953_s21  ;;  %s1180_s15 = scalar_lea.hbm %s2013_s2, 2048 }
  0x25   : > { %s1175_s18 = scalar_lea.hbm %s1603_s7, 1024  ;;  %p1181_p11 = scmp.lt.u32.totalorder %s1603_s7, %s2013_s2 }
  0x26   : > { %p1176_p7 = scmp.ne.s32.totalorder %s1603_s7, %s1175_s18  ;;  %p1182_p12 = scmp.lt.u32.totalorder %s1180_s15, %s1175_s18 }
  0x27   : > { %p1184_p1 = scmp.lt.u32.totalorder %s1175_s18, %s1603_s7 }
  0x28   : > { %p1178_p9 = pnand %p1177_p8, %p1176_p7  ;;  %p1183_p13 = por %p1182_p12, %p1181_p11 }
  0x2a   : > { %p1179_p10 = pneg %p1178_p9  ;;  %p1185_p3 = por %p1184_p1, %p1183_p13 }
  0x2c   : > { %p1186_p4 = pnand %p1185_p3, %p1179_p10 }
  0x2e   : > { %1189 = shalt.err (!%p1186_p4)
}
  0x2f   : > { %s1190_s17 = scalar_lea.vmem %s1605_s5, 1024  ;;  %s1459_s23 = smov [#allocation6]  }
  0x30   : > { %p1191_p7 = scmp.ne.s32.totalorder %s1605_s5, %s1190_s17  ;;  %s1195_s6 = sshll.u32 %s1459_s23, 4  ;;  %s1196_s6 = int_to_ptr.vmem [resolvable:$false] %s1195_s6 }
  0x31   : > { %s1197_s20 = scalar_lea.vmem %s1196_s6, 2048  ;;  %p1198_p2 = scmp.lt.s32.totalorder %s1605_s5, %s1196_s6 }
  0x32   : > { %p1193_p9 = pnand %p1191_p7, %p1177_p8  ;;  %p1199_p11 = scmp.lt.s32.totalorder %s1197_s20, %s1190_s17 }
  0x34   : > { %p1194_p5 = pneg %p1193_p9  ;;  %p1200_p12 = por %p1199_p11, %p1198_p2 }
  0x36   : > { %p1201_p13 = pnand %p1200_p12, %p1194_p5 }
  0x38   : > { %1204 = shalt.err (!%p1201_p13)
}
  0x39   : > { %s1989_s18 = smov 64   ;;  %s1990_s15 = smov 4  }
  0x3a   : > { %1040 = dma.hbm_to_vmem [thread:$0]  (!%p1611_p6), %s1603_s7, 1024, %s1605_s5, %s1615_s16, %s1989_s18, %s1989_s18, %s1990_s15  }
  0x3b   : > { %s1647_s21 = sadd.s32 4294967295, %s1457_s11   ;;  %s901_s22 = sadd.s32 4294967294, %s1457_s11  }
  0x3c   : > { %p108_p2 = scmp.ne.s32.totalorder %s1433_s28, %s1429_s27  ;;  %p1988_p5 = scmp.eq.s32.totalorder %s1647_s21, 0 }
  0x3d   : > { %p128_p8 = scmp.ne.s32.totalorder %s1425_s26, %s1421_s25  ;;  %p134_p10 = scmp.ne.s32.totalorder %s1421_s25, %s1417_s24 }
  0x3e   : > { %p1660_p1 = por %p1988_p5, %p108_p2  ;;  %p200_p6 = scmp.eq.s32.totalorder %s1647_s21, 5 }
  0x3f   : > { %p2016_p3 = scmp.eq.s32.totalorder %s1457_s11, 0  ;;  %p1669_p7 = por %p134_p10, %p1988_p5 }
  0x40   : > { %s2015_s13 = scalar_select %p1660_p1, 1, 0 }
  0x41   : > { %p130_p4 = por %p128_p8, %p2016_p3  ;;  %p1673_p9 = por %p200_p6, %p128_p8 }
  0x42   : > { %s2017_s5 = scalar_select %p1669_p7, 1, 0 }
  0x43   : > { %s2018_s7 = scalar_select %p1673_p9, 1, 0 }
  0x44   : > { %p206_p11 = scmp.eq.s32.totalorder %s901_s22, 5  ;;  %p902_p12 = scmp.ge.s32.totalorder %s1457_s11, 1 }
  0x45   : > { %p239_p13 = scmp.lt.s32.totalorder %s1457_s11, 7  ;;  %s1462_s6 = smov [#allocation3]  }
  0x46   : > { %p1679_p0 = por %p206_p11, %p134_p10  ;;  %s252_s20 = sshll.u32 %s1462_s6, 4  ;;  %s253_s20 = int_to_ptr.vmem [resolvable:$true] %s252_s20 }
  0x47   : > { %p1683_p2 = pnand %p902_p12, %p239_p13  ;;  %p2022_p3 = scmp.lt.s32.totalorder %s1457_s11, 6 }
  0x48   : > { %s2019_s27 = scalar_select %p1679_p0, 1, 0 }
  0x49   : > { %s2021_s23 = scalar_select %p1683_p2, 1, 0 }
  0x4a   : > { %2020 = sst [smem:[#allocation25_spill]] %s2019_s27  ;;  %p1689_p5 = pnand %p2022_p3, %p130_p4 }
  0x4b   : > { %p1030_p8 = pneg %p1683_p2  ;;  %p2024_p6 = scmp.eq.s32.totalorder %s1647_s21, 0 }
  0x4c   : > { %s2023_s17 = scalar_select %p1689_p5, 1, 0 }
  0x4d   : > { %p1697_p10 = pnand %p1030_p8, %p2024_p6  ;;  %s1463_s18 = smov [#allocation9]  }
  0x4e   : > { %s262_s15 = sshll.u32 %s1463_s18, 4  ;;  %s2026_s0 = sld [smem:[#allocation26_spill]]  ;;  %s1701_s15 = int_to_ptr.vmem [resolvable:$true] %s262_s15 }
  0x4f   : > { %p1207_p11 = pneg %p1697_p10 }
  0x54   : > { %s1205_s12 = scalar_lea.hbm %s2026_s0, 16 }
  0x55   : > { %p1206_p4 = scmp.ne.s32.totalorder %s2026_s0, %s1205_s12  ;;  %p1212_p3 = scmp.lt.u32.totalorder %s1205_s12, %s2026_s0 }
  0x57   : > { %p1208_p12 = pnand %p1207_p11, %p1206_p4 }
  0x59   : > { %p1209_p13 = pneg %p1208_p12 }
  0x5b   : > { %p1214_p8 = pnand %p1212_p3, %p1209_p13 }
  0x5d   : > { %1217 = shalt.err (!%p1214_p8)
}
  0x5e   : > { %s1218_s18 = scalar_lea.vmem %s253_s20, 16  ;;  %s1225_s2 = scalar_lea.vmem %s253_s20, 32 }
  0x5f   : > { %p1219_p6 = scmp.ne.s32.totalorder %s253_s20, %s1218_s18  ;;  %p1226_p7 = scmp.lt.s32.totalorder %s253_s20, %s253_s20 }
  0x60   : > { %p1227_p1 = scmp.lt.s32.totalorder %s1225_s2, %s1218_s18 }
  0x61   : > { %p1221_p0 = pnand %p1219_p6, %p1207_p11 }
  0x62   : > { %p1228_p2 = por %p1227_p1, %p1226_p7 }
  0x63   : > { %p1222_p9 = pneg %p1221_p0 }
  0x65   : > { %p1229_p5 = pnand %p1228_p2, %p1222_p9 }
  0x67   : > { %1232 = shalt.err (!%p1229_p5)
}
  0x68   : > { %1033 = dma.hbm_to_vmem [thread:$0]  (!%p1697_p10), %s2026_s0, 16, %s253_s20, [#allocation4]  }
  0x69   : > { %s1233_s27 = scalar_lea.hbm %s1979_s4, 1024 }
  0x6a   : > { %p1234_p0 = scmp.ne.s32.totalorder %s1979_s4, %s1233_s27  ;;  %p1240_p5 = scmp.lt.u32.totalorder %s1233_s27, %s1979_s4 }
  0x6c   : > { %p1236_p1 = pnand %p1234_p0, %p1207_p11 }
  0x6e   : > { %p1237_p7 = pneg %p1236_p1 }
  0x70   : > { %p1242_p9 = pnand %p1240_p5, %p1237_p7 }
  0x72   : > { %1245 = shalt.err (!%p1242_p9)
}
  0x73   : > { %s1246_s20 = scalar_lea.vmem %s1701_s15, 1024  ;;  %p1254_p13 = scmp.lt.s32.totalorder %s1701_s15, %s1701_s15 }
  0x74   : > { %p1247_p2 = scmp.ne.s32.totalorder %s1701_s15, %s1246_s20  ;;  %p1255_p3 = scmp.lt.s32.totalorder %s1246_s20, %s1246_s20 }
  0x76   : > { %p1249_p4 = pnand %p1247_p2, %p1207_p11  ;;  %p1256_p8 = por %p1255_p3, %p1254_p13 }
  0x78   : > { %p1250_p12 = pneg %p1249_p4 }
  0x7a   : > { %p1257_p6 = pnand %p1256_p8, %p1250_p12 }
  0x7c   : > { %1260 = shalt.err (!%p1257_p6)
}
  0x7d   : > { %s2027_s24 = smov 4   ;;  %s2028_s9 = smov 64  }
  0x7e   : > { %1036 = dma.hbm_to_vmem [thread:$0]  (!%p1697_p10), %s1979_s4, 1024, %s1701_s15, [#allocation10], %s2028_s9, %s2028_s9, %s2027_s24  }
  0x7f   : > { %s41_s19 = sadd.s32 1, %s1453_s10  ;;  %s308_s27 = sand.u32 1, %s1425_s26  }
  0x80   : > { %p2029_p11 = scmp.ne.s32.totalorder %s2009_s14, 0  ;;  %s909_s22 = sshll.u32 %s308_s27, 4 }
  0x81   : > { %s954_s6 = sshll.u32 %s1453_s10, 8  ;;  %s310_s29 = scalar_lea.vmem [#allocation8], %s909_s22 }
  0x82   : > { %s2062_s19 = smov (!%p2029_p11, %s41_s19), %s1453_s10  ;;  %s1762_s20 = scalar_lea.hbm %s1978_s3, %s954_s6 }
  0x83   : > { %p43_p0 = scmp.ge.s32.totalorder %s2062_s19, 3  ;;  %s317_s15 = sshll.u32 %s310_s29, 4  ;;  %s1766_s15 = int_to_ptr.vmem [resolvable:$true] %s317_s15 }
  0x84   : > { %s1261_s9 = scalar_lea.hbm %s1762_s20, 256  ;;  %p2031_p7 = scmp.ne.s32.totalorder %s2023_s17, 0 }
  0x85   : > { %s2064_s19 = smov (%p43_p0, %s2062_s19), 0  ;;  %p1262_p1 = scmp.ne.s32.totalorder %s1762_s20, %s1261_s9 }
  0x86   : > { %s118_s14 = ssub.s32 %s1453_s10, %s2064_s19  ;;  %p1263_p5 = pneg %p2031_p7 }
  0x87   : > { %p1770_p10 = scmp.eq.s32.totalorder %s118_s14, 0  ;;  %s1266_s22 = scalar_lea.hbm %s1978_s3, 768 }
  0x88   : > { %p1264_p9 = pnand %p1263_p5, %p1262_p1  ;;  %p1267_p4 = scmp.lt.u32.totalorder %s1762_s20, %s1978_s3 }
  0x89   : > { %p1268_p12 = scmp.lt.u32.totalorder %s1266_s22, %s1261_s9  ;;  %p1270_p3 = scmp.lt.u32.totalorder %s1261_s9, %s1762_s20 }
  0x8a   : > { %p1265_p2 = pneg %p1264_p9 }
  0x8b   : > { %p1269_p13 = por %p1268_p12, %p1267_p4 }
  0x8d   : > { %p1271_p8 = por %p1270_p3, %p1269_p13 }
  0x8f   : > { %p1272_p6 = pnand %p1271_p8, %p1265_p2 }
  0x91   : > { %1275 = shalt.err (!%p1272_p6)
}
  0x92   : > { %s1276_s2 = scalar_lea.vmem %s1766_s15, 256  ;;  %s1464_s29 = smov [#allocation8]  }
  0x93   : > { %p1277_p11 = scmp.ne.s32.totalorder %s1766_s15, %s1276_s2  ;;  %s1281_s14 = sshll.u32 %s1464_s29, 4  ;;  %s1282_s14 = int_to_ptr.vmem [resolvable:$false] %s1281_s14 }
  0x94   : > { %s1283_s12 = scalar_lea.vmem %s1282_s14, 512  ;;  %p1284_p9 = scmp.lt.s32.totalorder %s1766_s15, %s1282_s14 }
  0x95   : > { %p1279_p0 = pnand %p1277_p11, %p1263_p5  ;;  %p1285_p4 = scmp.lt.s32.totalorder %s1283_s12, %s1276_s2 }
  0x97   : > { %p1280_p1 = pneg %p1279_p0  ;;  %p1286_p12 = por %p1285_p4, %p1284_p9 }
  0x99   : > { %p1287_p13 = pnand %p1286_p12, %p1280_p1 }
  0x9b   : > { %1290 = shalt.err (!%p1287_p13)
}
  0x9c   : > { %s1465_s9 = smov 128   ;;  %s1466_s27 = smov 8  }
  0x9d   : > { %1043 = dma.hbm_to_vmem [thread:$0]  (!%p2031_p7), %s1762_s20, 256, %s1766_s15, %s1615_s16, %s1465_s9, %s1465_s9, %s1466_s27  }
  0x9e   : > { %s2032_s22 = sadd.s32 1, %s1425_s26  ;;  %p2033_p5 = scmp.ne.s32.totalorder %s2021_s23, 0 }
  0x9f   : > { %s1805_s6 = scalar_select %p1770_p10, %s1425_s26, %s2032_s22  }
  0xa0   : > { %329 = sbr.rel (%p2033_p5) target bundleno = 742 (0x2e6), region = 44  ;;  %p2034_p2 = scmp.eq.s32.totalorder (!%p2033_p5), %s1647_s21, 0 }
  0xa7   : > { %1392 = dma.done.wait (%p2034_p2), [#allocation4], 16   ;;  %p2035_p3 = pmov %p2034_p2 }
  0xa8   : > { %s335_s18 = sand.u32 1, %s1647_s21   ;;  %s337_s2 = sand.u32 1, %s1433_s28  }
  0xa9   : > { %1394 = vsyncadd (%p2035_p3), [#allocation4], 4294967280  ;;  %s914_s17 = sshll.u32 %s337_s2, 6  ;;  %s336_s16 = scalar_lea.sflag [#allocation7], %s335_s18 }
  0xaa   : > { %s1815_s20 = scalar_lea.vmem [#allocation6], %s914_s17  ;;  %p2036_p10 = scmp.ne.s32.totalorder %s2015_s13, 0 }
  0xac   : > { %1396 = dma.done.wait (%p2036_p10), %s336_s16, 1024  }
  0xad   : > { %1398 = vsyncadd (%p2036_p10), %s336_s16, 4294966272  ;;  %s1822_s23 = sand.u32 1, %s1421_s25   ;;  %p2037_p7 = scmp.ne.s32.totalorder %s2017_s5, 0 }
  0xae   : > { %s915_s15 = sshll.u32 %s1822_s23, 4 }
  0xaf   : > { %s1825_s24 = scalar_lea.vmem [#allocation8], %s915_s15 }
  0xb0   : > { %1400 = dma.done.wait (%p2037_p7), %s336_s16, 256  }
  0xb1   : > { %1402 = vsyncadd (%p2037_p7), %s336_s16, 4294967040  ;;  %p2038_p8 = pmov %p2034_p2 }
  0xb2   : > { %p2039_p6 = pmov %p2034_p2 }
  0xb3   : > { %1404 = dma.done.wait (%p2038_p8), [#allocation10], 1024  }
  0xb4   : > { %1406 = vsyncadd (%p2039_p6), [#allocation10], 4294966272  ;;  %s918_s13 = sshll.u32 %s1822_s23, 1  ;;  %p396_p11 = scmp.lt.s32.totalorder %s1441_s30, 1 }
  0xb5   : > { %s1844_s5 = scalar_lea.vmem [#allocation11], %s915_s15  ;;  %s1846_s27 = scalar_lea.vmem [#allocation12], %s918_s13 }
  0xb6   : > { %s1838_s29 = scalar_select %p396_p11, %s1441_s30, 1 }
  0xb7   : > { %p919_p0 = scmp.ne.s32.totalorder %s1441_s30, 0 }
  0xb8   : > { %s398_s9 = scalar_lea.vmem %s1976_s1, %s1838_s29  ;;  %v1467_v0 = vmov (!%p919_p0), 0.0  }
  0xb9   : > { %406 = sbr.rel (%p919_p0) target bundleno = 192 (0xc0), region = 64  ;;  %407 = vst [vmem:[#allocation2] sm:$0xff] (!%p919_p0), %v1467_v0  ;;  %408 = vst [vmem:[#allocation2 + $0x8] sm:$0xff] (!%p919_p0), %v1467_v0 }
  0xc0 PF: > { %v1159_v1 = vld [vmem:[%s1815_s20] sm:$0xff]   ;;  %v1468_v2 = vmov 0.0   ;;  %v1160_v3 = vld [vmem:[%s1815_s20 + $0x8] sm:$0xff]   ;;  %vm1469_vm0 = vmmov 0   ;;  %v1161_v4 = vld [vmem:[%s1815_s20 + $0x10] sm:$0xff]   ;;  %v409_v6 = vlaneseq  ;;  %s920_s21 = sshll.u32 %s1445_s8, 4 }
  0xc1   : > { %974 = vmatprep.subr.bf16.mxu0 %v1468_v2  ;;  %990 = vmatprep.mubr.msk.bf16.mxu0 %vm1469_vm0, %v1468_v2  ;;  %v1162_v5 = vld [vmem:[%s1815_s20 + $0x18] sm:$0xff]   ;;  %v1163_v7 = vld [vmem:[%s1815_s20 + $0x20] sm:$0xff]   ;;  %v1164_v9 = vld [vmem:[%s1815_s20 + $0x28] sm:$0xff]   ;;  %v413_v11 = vstv %s920_s21  ;;  %v1470_v17 = vmov 1.0|1.0   ;;  %p934_p1 = scmp.ne.s32.totalorder %s1441_s30, 1 }
  0xc2   : > { %975 = vmatpush3.bf16.msra.mxu0 %v1159_v1  ;;  %v410_v8 = vshrl.u32 %v409_v6, 7  ;;  %v1165_v12 = vld [vmem:[%s1815_s20 + $0x30] sm:$0xff]   ;;  %v921_v15 = vld [vmem:[%s398_s9] ss:$0 sm:$0xff]  ;;  %v1166_v16 = vld [vmem:[%s1815_s20 + $0x38] sm:$0xff]   ;;  %v1471_v27 = vmov (!%p934_p1), 0.0  }
  0xc3   : > { %976 = vmatprep.subr.bf16.mxu0 %v1468_v2  ;;  %v428_v18 = vld [vmem:[#allocation2] sm:$0xff]  ;;  %v429_v20 = vld [vmem:[#allocation2 + $0x8] sm:$0xff]  ;;  %v1167_v26 = vld [vmem:[#allocation9] sm:$0xff] (!%p934_p1)   ;;  %vm1472_vm4 = vmmov (!%p934_p1), 0   ;;  %s2040_s17 = sld [smem:[#allocation28_spill]] (!%p934_p1)  ;;  %vm698_vm7 = vcmask (!%p934_p1), 1040384  }
  0xc4   : > { %v411_v10 = vadd.s32 8, %v410_v8  ;;  %v1857_v13 = vadd.s32 %v413_v11, %v410_v8  ;;  %v1168_v28 = vld [vmem:[#allocation9 + $0x8] sm:$0xff] (!%p934_p1)   ;;  %v1169_v29 = vld [vmem:[#allocation9 + $0x10] sm:$0xff] (!%p934_p1)   ;;  %v1170_v30 = vld [vmem:[#allocation9 + $0x18] sm:$0xff] (!%p934_p1)   ;;  %v550_v33 = vsub.s32 (!%p934_p1), 0, %v410_v8 }
  0xc5   : > { %v543_v31 = vld [vmem:[#allocation3] sm:$0x1] (!%p934_p1)  ;;  %v1171_v34 = vld [vmem:[#allocation9 + $0x20] sm:$0xff] (!%p934_p1)   ;;  %v1172_v36 = vld [vmem:[#allocation9 + $0x28] sm:$0xff] (!%p934_p1)  }
  0xc6   : > { %977 = vmatpush3.bf16.msra.mxu0 %v1160_v3  ;;  %v1859_v14 = vadd.s32 %v413_v11, %v411_v10  ;;  %vm421_vm1 = vcmp.eq.s32.totalorder %v921_v15, %v1857_v13  ;;  %v544_v32 = vadd.f32 (!%p934_p1), 1.0, %v543_v31  ;;  %v545_v37 = vld [vmem:[%s1825_s24] sm:$0xff] (!%p934_p1)  ;;  %v546_v38 = vld [vmem:[%s1825_s24 + $0x8] sm:$0xff] (!%p934_p1)  ;;  %vm674_vm5 = vcmp.lt.s32.totalorder (!%p934_p1), %v1857_v13, 48 }
  0xc7   : > { %978 = vmatprep.subr.bf16.mxu0 %v1468_v2  ;;  %v1173_v41 = vld [vmem:[#allocation9 + $0x30] sm:$0xff] (!%p934_p1)   ;;  %v1174_v46 = vld [vmem:[#allocation9 + $0x38] sm:$0xff] (!%p934_p1)   ;;  %v944_v50 = vsel (!%p934_p1), %vm674_vm5, 1.0, %v1471_v27 }
  0xc8   : > { %vm422_vm2 = vcmp.eq.s32.totalorder %v921_v15, %v1859_v14  ;;  %v551_v35 = vrot.slane (!%p934_p1), %v544_v32, %v550_v33  ;;  %vm675_vm6 = vcmp.lt.s32.totalorder (!%p934_p1), %v1859_v14, 48 }
  0xc9   : > { %vm932_vm3 = vmpackc.low %vm422_vm2, %vm421_vm1  ;;  %v935_v48 = vld [vmem:[%s2040_s17] ss:$0 sm:$0xff] (!%p934_p1)  ;;  %v945_v54 = vsel (!%p934_p1), %vm675_vm6, 1.0, %v1471_v27 }
  0xca   : > { %979 = vmatpush3.bf16.msra.mxu0 %v1161_v4  ;;  %v553_v39 = vmul.f32 (!%p934_p1), %v551_v35, %v545_v37  ;;  %v554_v40 = vmul.f32 (!%p934_p1), %v551_v35, %v546_v38 }
  0xcb   : > { %980 = vmatprep.subr.bf16.mxu0 %v1468_v2 }
  0xce   : > { %981 = vmatpush3.bf16.msra.mxu0 %v1162_v5 }
  0xcf   : > { %982 = vmatprep.subr.bf16.mxu0 %v1468_v2 }
  0xd2   : > { %983 = vmatpush3.bf16.msra.mxu0 %v1163_v7 }
  0xd3   : > { %984 = vmatprep.subr.bf16.mxu0 %v1468_v2 }
  0xd6   : > { %985 = vmatpush3.bf16.msra.mxu0 %v1164_v9 }
  0xd7   : > { %986 = vmatprep.subr.bf16.mxu0 %v1468_v2 }
  0xda   : > { %987 = vmatpush3.bf16.msra.mxu0 %v1165_v12 }
  0xdb   : > { %988 = vmatprep.subr.bf16.mxu0 %v1468_v2 }
  0xde   : > { %989 = vmatpush3.bf16.msra.mxu0 %v1166_v16 }
  0xdf   : > { %994 = vmatprep.subr.bf16.mxu0 (!%p934_p1), %v1471_v27 }
  0xe1   : > { %991 = vmatmul.mubr.msk.bf16.vlgmr.msra.gmra.mrb[0].mxu0 %vm932_vm3, %v1470_v17 }
  0xe2   : > { %995 = vmatpush3.bf16.msra.mxu0 (!%p934_p1), %v1167_v26  ;;  %1010 = vmatprep.mubr.msk.bf16.mxu0 (!%p934_p1), %vm1472_vm4, %v1471_v27 }
  0xe3   : > { %996 = vmatprep.subr.bf16.mxu0 (!%p934_p1), %v1471_v27 }
  0xe6   : > { %997 = vmatpush3.bf16.msra.mxu0 (!%p934_p1), %v1168_v28 }
  0xe7   : > { %998 = vmatprep.subr.bf16.mxu0 (!%p934_p1), %v1471_v27 }
  0xea   : > { %999 = vmatpush3.bf16.msra.mxu0 (!%p934_p1), %v1169_v29 }
  0xeb   : > { %1000 = vmatprep.subr.bf16.mxu0 (!%p934_p1), %v1471_v27 }
  0xee   : > { %1001 = vmatpush3.bf16.msra.mxu0 (!%p934_p1), %v1170_v30 }
  0xef   : > { %1002 = vmatprep.subr.bf16.mxu0 (!%p934_p1), %v1471_v27 }
  0xf2   : > { %1003 = vmatpush3.bf16.msra.mxu0 (!%p934_p1), %v1171_v34 }
  0xf3   : > { %1004 = vmatprep.subr.bf16.mxu0 (!%p934_p1), %v1471_v27 }
  0xf6   : > { %1005 = vmatpush3.bf16.msra.mxu0 (!%p934_p1), %v1172_v36 }
  0xf7   : > { %1006 = vmatprep.subr.bf16.mxu0 (!%p934_p1), %v1471_v27 }
  0xfa   : > { %1007 = vmatpush3.bf16.msra.mxu0 (!%p934_p1), %v1173_v41 }
  0xfb   : > { %1008 = vmatprep.subr.bf16.mxu0 (!%p934_p1), %v1471_v27 }
  0xfe   : > { %1009 = vmatpush3.bf16.msra.mxu0 (!%p934_p1), %v1174_v46 }
 0x1b3   : > { %542 = sbr.rel (%p934_p1) target bundleno = 689 (0x2b1), region = 68 }
 0x1b4   : > { %v528_v19 = vpop.f32.mrb[0].mxu0 }
 0x1b5   : > { %v535_v21 = vadd.f32 %v528_v19, %v428_v18  ;;  %v992_v22 = vpop.f32.mrb[1].mxu0 }
 0x1b6   : > { %v531_v23 = vpop.f32.mrb[2].mxu0 }
 0x1b7   : > { %537 = vst [vmem:[#allocation2] sm:$0xff] %v535_v21  ;;  %v536_v24 = vadd.f32 %v531_v23, %v429_v20  ;;  %v993_v25 = vpop.f32.mrb[3].mxu0 }
 0x1b9   : > { %538 = vst [vmem:[#allocation2 + $0x8] sm:$0xff] %v536_v24 }
 0x1be   : > { %v555_v42 = vld [vmem:[#allocation2] sm:$0xff] }
 0x1bf   : > { %v557_v44 = vadd.f32 %v555_v42, %v553_v39 }
 0x1c0   : > { %v556_v43 = vld [vmem:[#allocation2 + $0x8] sm:$0xff] }
 0x1c1   : > { %v558_v45 = vadd.f32 %v556_v43, %v554_v40 }
 0x1c3   : > { %v559_v47 = vpack.c.bf16 %v558_v45, %v557_v44 }
 0x1c5   : > { %1011 = vmatmul.mubr.bf16.vlgmr.msra.gmra.mrb[0].mxu0 %v559_v47 }
 0x298   : > { %v665_v49 = vpop.f32.mrb[0].mxu0 }
 0x299   : > { %v666_v51 = vadd.f32 %v935_v48, %v665_v49  ;;  %v1012_v52 = vpop.f32.mrb[1].mxu0 }
 0x29a   : > { %v668_v53 = vpop.f32.mrb[2].mxu0 }
 0x29b   : > { %672 = vst [vmem:[%s1844_s5] sm:$0xff] %v666_v51  ;;  %v680_v55 = vmul.f32 %v944_v50, %v666_v51  ;;  %v669_v56 = vadd.f32 %v935_v48, %v668_v53  ;;  %v1013_v57 = vpop.f32.mrb[3].mxu0 }
 0x29d   : > { %673 = vst [vmem:[%s1844_s5 + $0x8] sm:$0xff] %v669_v56  ;;  %v681_v58 = vmul.f32 %v945_v54, %v669_v56  ;;  %v689_v59 = vmul.f32 %v680_v55, %v666_v51 }
 0x29f   : > { %v682_v60 = vadd.f32 %v681_v58, %v680_v55  ;;  %v690_v61 = vmul.f32 %v681_v58, %v669_v56 }
 0x2a1   : > { %v683_v62 = vrot.slane %v682_v60, 4  ;;  %v691_v63 = vadd.f32 %v690_v61, %v689_v59 }
 0x2a3   : > { %v684_v0 = vadd.f32 %v683_v62, %v682_v60  ;;  %v692_v1 = vrot.slane %v691_v63, 4 }
 0x2a5   : > { %v685_v2 = vrot.slane %v684_v0, 2  ;;  %v693_v3 = vadd.f32 %v692_v1, %v691_v63 }
 0x2a7   : > { %v686_v4 = vadd.f32 %v685_v2, %v684_v0  ;;  %v694_v5 = vrot.slane %v693_v3, 2 }
 0x2a9   : > { %v687_v6 = vrot.slane %v686_v4, 1  ;;  %v695_v7 = vadd.f32 %v694_v5, %v693_v3 }
 0x2ab   : > { %v696_v8 = vrot.slane %v695_v7, 1  ;;  %v688_v9 = vadd.f32 %v687_v6, %v686_v4 }
 0x2ad   : > { %v697_v10 = vadd.f32 %v696_v8, %v695_v7 }
 0x2af   : > { %v699_v11 = vsel %vm698_vm7, %v688_v9, %v697_v10 }
 0x2b0   : > { %700 = vst [vmem:[%s1846_s27] sm:$0x3] %v699_v11 }
 0x2b1 PF: > { %s955_s16 = sshll.u32 %s1445_s8, 8  ;;  %s2041_s24 = sld [smem:[#allocation29_spill]] }
 0x2b2   : > { %s720_s14 = sshll.u32 %s1844_s5, 4  ;;  %s702_s12 = scalar_lea.sflag [#allocation5], %s1822_s23  ;;  %s1887_s14 = int_to_ptr.vmem [resolvable:$true] %s720_s14 }
 0x2b3   : > { %s1291_s9 = scalar_lea.vmem %s1887_s14, 256  ;;  %p2043_p4 = scmp.ne.s32.totalorder %s2018_s7, 0 }
 0x2b4   : > { %p1292_p9 = scmp.ne.s32.totalorder %s1887_s14, %s1291_s9  ;;  %s1473_s21 = smov [#allocation11]  }
 0x2b5   : > { %s1295_s22 = sshll.u32 %s1473_s21, 4  ;;  %s1296_s22 = int_to_ptr.vmem [resolvable:$false] %s1295_s22 }
 0x2b6   : > { %p1293_p12 = pnand %p1292_p9, %p2043_p4  ;;  %s1297_s18 = scalar_lea.vmem %s1296_s22, 512 }
 0x2b7   : > { %s2042_s13 = smov %s2041_s24  ;;  %s1884_s29 = scalar_lea.hbm %s2041_s24, %s955_s16 }
 0x2b8   : > { %p1294_p13 = pneg %p1293_p12  ;;  %p1298_p5 = scmp.lt.s32.totalorder %s1887_s14, %s1296_s22 }
 0x2b9   : > { %p1299_p2 = scmp.lt.s32.totalorder %s1297_s18, %s1291_s9 }
 0x2bb   : > { %p1300_p3 = por %p1299_p2, %p1298_p5 }
 0x2bd   : > { %p1301_p10 = pnand %p1300_p3, %p1294_p13 }
 0x2bf   : > { %1304 = shalt.err (!%p1301_p10)
}
 0x2c0   : > { %s1305_s5 = scalar_lea.hbm %s1884_s29, 256  ;;  %s1309_s17 = scalar_lea.hbm %s2042_s13, 768 }
 0x2c1   : > { %p1306_p7 = scmp.ne.s32.totalorder %s1884_s29, %s1305_s5  ;;  %p1310_p11 = scmp.lt.u32.totalorder %s1884_s29, %s2042_s13 }
 0x2c2   : > { %p1311_p0 = scmp.lt.u32.totalorder %s1309_s17, %s1305_s5  ;;  %p1313_p9 = scmp.lt.u32.totalorder %s1305_s5, %s1884_s29 }
 0x2c3   : > { %p1307_p8 = pnand %p1306_p7, %p2043_p4 }
 0x2c4   : > { %p1312_p1 = por %p1311_p0, %p1310_p11 }
 0x2c5   : > { %p1308_p6 = pneg %p1307_p8 }
 0x2c6   : > { %p1314_p12 = por %p1313_p9, %p1312_p1 }
 0x2c8   : > { %p1315_p13 = pnand %p1314_p12, %p1308_p6 }
 0x2ca   : > { %1318 = shalt.err (!%p1315_p13)
}
 0x2cb   : > { %s1474_s15 = smov 128   ;;  %s1475_s24 = smov 8  }
 0x2cc   : > { %1026 = dma.vmem_to_hbm [thread:$0]  (%p2043_p4), %s1887_s14, 256, %s1884_s29, %s702_s12, %s1474_s15, %s1474_s15, %s1475_s24  }
 0x2cd   : > { %s950_s9 = sshll.u32 %s1445_s8, 5  ;;  %s736_s21 = sshll.u32 %s1846_s27, 4  ;;  %s737_s21 = int_to_ptr.vmem [resolvable:$true] %s736_s21 }
 0x2ce   : > { %s2044_s5 = sld [smem:[#allocation30_spill]]  ;;  %s707_s2 = scalar_lea.sflag [#allocation13], %s1822_s23 }
 0x2cf   : > { %s1319_s17 = scalar_lea.vmem %s737_s21, 32  ;;  %s1476_s16 = smov [#allocation12]  }
 0x2d0   : > { %p1320_p5 = scmp.ne.s32.totalorder %s737_s21, %s1319_s17  ;;  %s1323_s20 = sshll.u32 %s1476_s16, 4  ;;  %s1324_s20 = int_to_ptr.vmem [resolvable:$false] %s1323_s20 }
 0x2d1   : > { %s1325_s0 = scalar_lea.vmem %s1324_s20, 64  ;;  %p1326_p10 = scmp.lt.s32.totalorder %s737_s21, %s1324_s20 }
 0x2d2   : > { %p1321_p2 = pnand %p1320_p5, %p2043_p4  ;;  %p1327_p7 = scmp.lt.s32.totalorder %s1325_s0, %s1319_s17 }
 0x2d4   : > { %s1918_s30 = scalar_lea.hbm %s2044_s5, %s950_s9  ;;  %p1322_p3 = pneg %p1321_p2 }
 0x2d5   : > { %p1328_p8 = por %p1327_p7, %p1326_p10 }
 0x2d7   : > { %p1329_p6 = pnand %p1328_p8, %p1322_p3 }
 0x2d9   : > { %1332 = shalt.err (!%p1329_p6)
}
 0x2da   : > { %s1333_s8 = scalar_lea.hbm %s1918_s30, 32  ;;  %s1337_s29 = scalar_lea.hbm %s2044_s5, 96 }
 0x2db   : > { %p1334_p11 = scmp.ne.s32.totalorder %s1918_s30, %s1333_s8  ;;  %p1338_p9 = scmp.lt.u32.totalorder %s1918_s30, %s2044_s5 }
 0x2dc   : > { %p1339_p12 = scmp.lt.u32.totalorder %s1337_s29, %s1333_s8  ;;  %p1341_p5 = scmp.lt.u32.totalorder %s1333_s8, %s1918_s30 }
 0x2dd   : > { %p1335_p0 = pnand %p1334_p11, %p2043_p4 }
 0x2de   : > { %p1340_p13 = por %p1339_p12, %p1338_p9 }
 0x2df   : > { %p1336_p1 = pneg %p1335_p0 }
 0x2e0   : > { %p1342_p2 = por %p1341_p5, %p1340_p13 }
 0x2e2   : > { %p1343_p3 = pnand %p1342_p2, %p1336_p1 }
 0x2e4   : > { %1346 = shalt.err (!%p1343_p3)
}
 0x2e5   : > { %1027 = dma.vmem_to_hbm [thread:$0]  (%p2043_p4), %s737_s21, 32, %s1918_s30, %s707_s2  }
 0x2e6 PF: > { %s2045_s0 = sld [smem:[#allocation20_spill]]  ;;  %s2046_s15 = sld [smem:[#allocation25_spill]] }
 0x2e7   : > { %p1056_p10 = scmp.ge.s32.totalorder %s1457_s11, 2 }
 0x2ec   : > { %s748_s24 = sand.u32 1, %s2045_s0   ;;  %p2047_p7 = scmp.ne.s32.totalorder %s2046_s15, 0 }
 0x2ed   : > { %s749_s9 = scalar_lea.sflag [#allocation5], %s748_s24 }
 0x2ee   : > { %p1045_p8 = pnand %p1056_p10, %p2047_p7 }
 0x2f0   : > { %1408 = dma.done.wait (!%p1045_p8), %s749_s9, 256  }
 0x2f1   : > { %1410 = vsyncadd (!%p1045_p8), %s749_s9, 4294967040  ;;  %s758_s22 = scalar_lea.sflag [#allocation13], %s748_s24 }
 0x2f2   : > { %1412 = dma.done.wait (!%p1045_p8), %s758_s22, 32  }
 0x2f3   : > { %1414 = vsyncadd (!%p1045_p8), %s758_s22, 4294967264  ;;  %s29_s11 = sadd.s32 1, %s1457_s11   ;;  %s2048_s7 = sld [smem:[#allocation21_spill]] }
 0x2f4   : > { %p26_p6 = scmp.ge.s32.totalorder %s29_s11, 8   ;;  %s2049_s29 = sld [smem:[#allocation24_spill]] }
 0x2f5   : > { %s2050_s30 = sld [smem:[#allocation22_spill]]  ;;  %s2051_s9 = sld [smem:[#allocation23_spill]] }
 0x2f6   : > { %s2052_s24 = smov %s1421_s25  ;;  %s2053_s25 = smov %s1425_s26 }
 0x2f7   : > { %s2054_s26 = smov %s1805_s6  ;;  %s2055_s27 = smov %s1433_s28 }
 0x2f8   : > { %s2057_s8 = smov %s1453_s10  ;;  %s2058_s10 = smov %s2064_s19 }
 0x2f9   : > { %s2056_s28 = smov %s2048_s7  ;;  %28 = sbr.rel (!%p26_p6) target bundleno = 19 (0x13), region = 137 }
 0x300   :  { %763 = vsyncpa [#allocation4], 1 }
 0x301   :  { %765 = vsyncpa [#allocation4 + $0x1], 1 }
 0x302   :  { %766 = vsyncpa [#allocation7], 1 }
 0x303   :  { %768 = vsyncpa [#allocation7 + $0x1], 1 }
 0x304   :  { %769 = vsyncpa [#allocation10], 1 }
 0x305   :  { %770 = vsyncpa [#allocation5], 1 }
 0x306   :  { %772 = vsyncpa [#allocation5 + $0x1], 1 }
 0x307   :  { %773 = vsyncpa [#allocation13], 1 }
 0x308   :  { %775 = vsyncpa [#allocation13 + $0x1], 1 }

</bundles_post_ra>
